<compile_context>
chip_gen: v7x
topology: tpu7x:2x2x1
jax: 0.10.0
libtpu: 0.0.40
codegen_flags: <defaults>
</compile_context>

<pallas_src>
import numpy as np
import jax
import jax.numpy as jnp
from jax.experimental import pallas as pl
from jax.experimental.pallas import tpu as pltpu

# ---- module hyper-parameters (from __init__) --------------------------------
NUM_BUCKETS = 400
RESOLUTION = 20          # samples per window
N_WINDOWS = 12           # self.n  (decay band width)
HALF_LIFE = 12           # self.half_life_cpu

MIN_CPU = 0.0
MAX_CPU = 1.0
MEAN_CPU = 0.5

BUCKET_SIZE = (MAX_CPU - abs(MIN_CPU)) / NUM_BUCKETS      # 0.0025
INV_BUCKET_SIZE = 1.0 / BUCKET_SIZE
PAD_VALUE = -1.0         # out-of-range sentinel -> treated as "no sample"

LANE = 128


# ---- Pallas kernel -----------------------------------------------------------
def _recommender_kernel(x_ref, out_ref):
    """x_ref: [S_BLK, RESOLUTION, W_pad] batch of series (windows on lanes).
       out_ref: [S_BLK, W_pad] per-window weighted-average recommendation."""
    s_blk = out_ref.shape[0]
    x = x_ref[...]                                            # [S_BLK, R, W_pad] f32

    # 1) quantize every sample to its bucket value (uniform bins).  The value
    #    is the bucket UPPER edge, (idx+1)*BUCKET_SIZE == cpu_buckets[idx].
    #    This replaces the 400-bin histogram: the weighted mean is linear in
    #    the counts, so sum-of-bucket-values / count is identical.
    valid = jnp.logical_and(x >= MIN_CPU, x <= MAX_CPU)       # pad / OOR -> False
    idx = jnp.clip(jnp.floor((x - MIN_CPU) * INV_BUCKET_SIZE),
                   0.0, float(NUM_BUCKETS - 1))
    bucket_val = MIN_CPU + (idx + 1.0) * BUCKET_SIZE          # == cpu_buckets[idx]
    q = jnp.where(valid, bucket_val, 0.0)
    cnt = valid.astype(jnp.float32)

    # 2) per-window (numerator, valid-count): reduce over the R samples axis,
    #    stacked sublane-dense so the band loop runs on full vregs.
    s = jnp.sum(q, axis=1)                                    # [S_BLK, W_pad]
    c = jnp.sum(cnt, axis=1)                                  # [S_BLK, W_pad]
    z = jnp.concatenate([s, c], axis=0)                       # [2*S_BLK, W_pad]

    # 3) banded exponential-decay aggregation over the last n windows:
    #    11 unmasked lane rolls (XLU).  The wrapper guarantees >= N_WINDOWS-1
    #    trailing pad windows with s=c=0, so the circular wrap adds only zeros.
    acc = z                                                   # age 0, weight 1.0
    for age in range(1, N_WINDOWS):
        w = 0.5 ** (age / HALF_LIFE)
        acc = acc + pltpu.roll(z, shift=age, axis=1) * w      # acc[:,i] += w*z[:,i-age]

    # 4) weighted-average recommendation per window (EUP reciprocal).
    numer = acc[:s_blk, :]
    denom = acc[s_blk:, :]
    inv = pl.reciprocal(jnp.maximum(denom, 1e-6), approx=True)
    out_ref[...] = jnp.where(denom > 0.0, numer * inv, MEAN_CPU)


# ---- helpers -----------------------------------------------------------------
def _choose_series_block(num_series: int) -> int:
    """Series per grid step: multiple of 8 (sublane-aligned output block),
    >= 2 grid steps when there is enough work (v7x megacore), and capped so
    the input tile stays ~1.3 MiB (128*20*128*4 B) -- comfortably inside the
    scoped VMEM default on v5e/v6e/v7x with double-buffering."""
    s8 = -(-num_series // 8) * 8
    if s8 <= 16:
        return s8
    half = -(-(s8 // 2) // 8) * 8
    return min(128, half)


# ---- wrapper -----------------------------------------------------------------
def predict(time_series_list):
    lengths = [int(ts.shape[0]) for ts in time_series_list]
    num_series = len(time_series_list)
    t_max = max(lengths)
    num_w = -(-t_max // RESOLUTION)                   # common window count
    # Lane-dense window axis with >= N_WINDOWS-1 guaranteed zero pad windows
    # (lets the kernel drop the per-age wrap mask).
    w_pad = -(-(num_w + N_WINDOWS - 1) // LANE) * LANE

    s_blk = _choose_series_block(num_series)
    s_pad = -(-num_series // s_blk) * s_blk
    grid = (s_pad // s_blk,)

    # Single host-side slab build -> one contiguous [S_pad, R, W_pad] transfer.
    slab = np.full((s_pad, RESOLUTION, w_pad), PAD_VALUE, dtype=np.float32)
    for i, (ts, t) in enumerate(zip(time_series_list, lengths)):
        flat = np.full((num_w * RESOLUTION,), PAD_VALUE, dtype=np.float32)
        flat[:t] = np.asarray(ts, dtype=np.float32)
        slab[i, :, :num_w] = flat.reshape(num_w, RESOLUTION).T   # windows -> lanes
    x_all = jnp.asarray(slab)

    cost = pl.CostEstimate(
        flops=int(s_pad) * RESOLUTION * w_pad * 12 + int(s_pad) * w_pad * 2 * N_WINDOWS * 2,
        transcendentals=int(s_pad) * w_pad,
        bytes_accessed=int(s_pad) * RESOLUTION * w_pad * 4 + int(s_pad) * w_pad * 4,
    )

    rec = pl.pallas_call(
        _recommender_kernel,
        out_shape=jax.ShapeDtypeStruct((s_pad, w_pad), jnp.float32),
        grid=grid,
        in_specs=[pl.BlockSpec((s_blk, RESOLUTION, w_pad), lambda i: (i, 0, 0))],
        out_specs=pl.BlockSpec((s_blk, w_pad), lambda i: (i, 0)),
        compiler_params=pltpu.CompilerParams(
            dimension_semantics=("parallel",)),       # shard series blocks over TCs
        cost_estimate=cost,
    )(x_all)                                          # [S_pad, W_pad]

    # Granular expansion + per-series length slice (cheap layout work in XLA).
    rec = rec[:num_series, :num_w]                    # [S, W]
    granular = jnp.broadcast_to(
        rec[:, :, None], (num_series, num_w, RESOLUTION)
    ).reshape(num_series, num_w * RESOLUTION)
    return [granular[i, :lengths[i]] for i in range(num_series)]


# ---- pure-JAX reference (same reconstructed semantics) -----------------------
def _reference_predict(time_series_list):
    outs = []
    for ts in time_series_list:
        t = int(ts.shape[0])
        num_w = -(-t // RESOLUTION)
        x = jnp.full((num_w * RESOLUTION,), PAD_VALUE, jnp.float32)
        x = x.at[:t].set(ts.astype(jnp.float32)).reshape(num_w, RESOLUTION)
        valid = jnp.logical_and(x >= MIN_CPU, x <= MAX_CPU)
        idx = jnp.clip(jnp.floor((x - MIN_CPU) * INV_BUCKET_SIZE),
                       0.0, float(NUM_BUCKETS - 1))
        bucket_val = MIN_CPU + (idx + 1.0) * BUCKET_SIZE
        q = jnp.where(valid, bucket_val, 0.0)
        s = q.sum(axis=1)
        c = valid.astype(jnp.float32).sum(axis=1)
        ws = jnp.zeros((num_w,), jnp.float32)
        wc = jnp.zeros((num_w,), jnp.float32)
        for a in range(min(N_WINDOWS, num_w)):
            w = 0.5 ** (a / HALF_LIFE)
            ws = ws.at[a:].add(w * s[: num_w - a])
            wc = wc.at[a:].add(w * c[: num_w - a])
        rec = jnp.where(wc > 0, ws / jnp.maximum(wc, 1e-12), MEAN_CPU)
        outs.append(jnp.broadcast_to(rec[:, None],
                                     (num_w, RESOLUTION)).reshape(-1)[:t])
    return outs


if __name__ == "__main__":
    key = jax.random.PRNGKey(0)
    k1, k2, k3 = jax.random.split(key, 3)
    ts1 = jax.random.uniform(k1, (160,), jnp.float32, MIN_CPU, MAX_CPU)
    ts2 = jax.random.uniform(k2, (147,), jnp.float32, MIN_CPU, MAX_CPU)
    ts3 = jax.random.uniform(k3, (95,), jnp.float32, MIN_CPU, MAX_CPU)
    series = [ts1, ts2, ts3]

    outs = predict(series)
    for o in outs:
        jax.block_until_ready(o)

    refs = _reference_predict(series)
    assert outs[0].shape == (160,) and outs[1].shape == (147,) and outs[2].shape == (95,)
    for o, r in zip(outs, refs):
        assert bool(jnp.all(jnp.isfinite(o)))
        max_err = float(jnp.max(jnp.abs(o - r)))
        assert max_err < 5e-3, max_err
    print("KERNEL_OK")
</pallas_src>

<mosaic_0001>
module attributes {stable_mosaic.version = 11 : i64} {
  func.func @_recommender_kernel(%arg0: i32, %arg1: memref<8x20x128xf32, #tpu.memory_space<vmem>>, %arg2: memref<8x128xf32, #tpu.memory_space<vmem>>) attributes {dimension_semantics = [#tpu.dimension_semantics<parallel>], iteration_bounds = array<i64: 1>, scalar_prefetch = 0 : i64, scratch_operands = 0 : i64, tpu.core_type = #tpu.core_type<tc>, window_params = [{transform_indices = @transform_0, window_bounds = array<i64: 8, 20, 128>}, {transform_indices = @transform_1, window_bounds = array<i64: 8, 128>}]} {
    %c0 = arith.constant 0 : index
    %c0_0 = arith.constant 0 : index
    %c0_1 = arith.constant 0 : index
    %0 = vector.load %arg1[%c0, %c0_0, %c0_1] : memref<8x20x128xf32, #tpu.memory_space<vmem>>, vector<8x20x128xf32>
    %cst = arith.constant 0.000000e+00 : f32
    %1 = vector.broadcast %cst : f32 to vector<8x20x128xf32>
    %2 = arith.cmpf oge, %0, %1 : vector<8x20x128xf32>
    %cst_2 = arith.constant 1.000000e+00 : f32
    %3 = vector.broadcast %cst_2 : f32 to vector<8x20x128xf32>
    %4 = arith.cmpf ole, %0, %3 : vector<8x20x128xf32>
    %5 = arith.andi %2, %4 : vector<8x20x128xi1>
    %cst_3 = arith.constant 0.000000e+00 : f32
    %6 = vector.broadcast %cst_3 : f32 to vector<8x20x128xf32>
    %7 = arith.subf %0, %6 : vector<8x20x128xf32>
    %cst_4 = arith.constant 4.000000e+02 : f32
    %8 = vector.broadcast %cst_4 : f32 to vector<8x20x128xf32>
    %9 = arith.mulf %7, %8 : vector<8x20x128xf32>
    %10 = math.floor %9 : vector<8x20x128xf32>
    %cst_5 = arith.constant 0.000000e+00 : f32
    %cst_6 = arith.constant 3.990000e+02 : f32
    %11 = vector.broadcast %cst_5 : f32 to vector<8x20x128xf32>
    %12 = arith.maximumf %11, %10 : vector<8x20x128xf32>
    %13 = vector.broadcast %cst_6 : f32 to vector<8x20x128xf32>
    %14 = arith.minimumf %13, %12 : vector<8x20x128xf32>
    %cst_7 = arith.constant 1.000000e+00 : f32
    %15 = vector.broadcast %cst_7 : f32 to vector<8x20x128xf32>
    %16 = arith.addf %14, %15 : vector<8x20x128xf32>
    %cst_8 = arith.constant 2.500000e-03 : f32
    %17 = vector.broadcast %cst_8 : f32 to vector<8x20x128xf32>
    %18 = arith.mulf %16, %17 : vector<8x20x128xf32>
    %cst_9 = arith.constant 0.000000e+00 : f32
    %19 = vector.broadcast %cst_9 : f32 to vector<8x20x128xf32>
    %20 = arith.addf %19, %18 : vector<8x20x128xf32>
    %cst_10 = arith.constant 0.000000e+00 : f32
    %21 = vector.broadcast %cst_10 : f32 to vector<8x20x128xf32>
    %22 = arith.select %5, %20, %21 : vector<8x20x128xi1>, vector<8x20x128xf32>
    %23 = arith.extui %5 : vector<8x20x128xi1> to vector<8x20x128xi32>
    %24 = arith.sitofp %23 : vector<8x20x128xi32> to vector<8x20x128xf32>
    %cst_11 = arith.constant dense<0.000000e+00> : vector<8x128xf32>
    %25 = vector.multi_reduction <add>, %22, %cst_11 [1] : vector<8x20x128xf32> to vector<8x128xf32>
    %cst_12 = arith.constant dense<0.000000e+00> : vector<8x128xf32>
    %26 = vector.multi_reduction <add>, %24, %cst_12 [1] : vector<8x20x128xf32> to vector<8x128xf32>
    %27 = tpu.concatenate %25, %26 in 0 : vector<8x128xf32>, vector<8x128xf32> -> vector<16x128xf32>
    %c1_i32 = arith.constant 1 : i32
    %28 = tpu.dynamic_rotate %27 by %c1_i32 dim 1 : vector<16x128xf32>, i32 -> vector<16x128xf32>
    %cst_13 = arith.constant 0.943874299 : f32
    %29 = vector.broadcast %cst_13 : f32 to vector<16x128xf32>
    %30 = arith.mulf %28, %29 : vector<16x128xf32>
    %31 = arith.addf %27, %30 : vector<16x128xf32>
    %c2_i32 = arith.constant 2 : i32
    %32 = tpu.dynamic_rotate %27 by %c2_i32 dim 1 : vector<16x128xf32>, i32 -> vector<16x128xf32>
    %cst_14 = arith.constant 0.890898704 : f32
    %33 = vector.broadcast %cst_14 : f32 to vector<16x128xf32>
    %34 = arith.mulf %32, %33 : vector<16x128xf32>
    %35 = arith.addf %31, %34 : vector<16x128xf32>
    %c3_i32 = arith.constant 3 : i32
    %36 = tpu.dynamic_rotate %27 by %c3_i32 dim 1 : vector<16x128xf32>, i32 -> vector<16x128xf32>
    %cst_15 = arith.constant 0.840896427 : f32
    %37 = vector.broadcast %cst_15 : f32 to vector<16x128xf32>
    %38 = arith.mulf %36, %37 : vector<16x128xf32>
    %39 = arith.addf %35, %38 : vector<16x128xf32>
    %c4_i32 = arith.constant 4 : i32
    %40 = tpu.dynamic_rotate %27 by %c4_i32 dim 1 : vector<16x128xf32>, i32 -> vector<16x128xf32>
    %cst_16 = arith.constant 0.793700516 : f32
    %41 = vector.broadcast %cst_16 : f32 to vector<16x128xf32>
    %42 = arith.mulf %40, %41 : vector<16x128xf32>
    %43 = arith.addf %39, %42 : vector<16x128xf32>
    %c5_i32 = arith.constant 5 : i32
    %44 = tpu.dynamic_rotate %27 by %c5_i32 dim 1 : vector<16x128xf32>, i32 -> vector<16x128xf32>
    %cst_17 = arith.constant 0.749153554 : f32
    %45 = vector.broadcast %cst_17 : f32 to vector<16x128xf32>
    %46 = arith.mulf %44, %45 : vector<16x128xf32>
    %47 = arith.addf %43, %46 : vector<16x128xf32>
    %c6_i32 = arith.constant 6 : i32
    %48 = tpu.dynamic_rotate %27 by %c6_i32 dim 1 : vector<16x128xf32>, i32 -> vector<16x128xf32>
    %cst_18 = arith.constant 0.707106769 : f32
    %49 = vector.broadcast %cst_18 : f32 to vector<16x128xf32>
    %50 = arith.mulf %48, %49 : vector<16x128xf32>
    %51 = arith.addf %47, %50 : vector<16x128xf32>
    %c7_i32 = arith.constant 7 : i32
    %52 = tpu.dynamic_rotate %27 by %c7_i32 dim 1 : vector<16x128xf32>, i32 -> vector<16x128xf32>
    %cst_19 = arith.constant 0.66741991 : f32
    %53 = vector.broadcast %cst_19 : f32 to vector<16x128xf32>
    %54 = arith.mulf %52, %53 : vector<16x128xf32>
    %55 = arith.addf %51, %54 : vector<16x128xf32>
    %c8_i32 = arith.constant 8 : i32
    %56 = tpu.dynamic_rotate %27 by %c8_i32 dim 1 : vector<16x128xf32>, i32 -> vector<16x128xf32>
    %cst_20 = arith.constant 0.629960536 : f32
    %57 = vector.broadcast %cst_20 : f32 to vector<16x128xf32>
    %58 = arith.mulf %56, %57 : vector<16x128xf32>
    %59 = arith.addf %55, %58 : vector<16x128xf32>
    %c9_i32 = arith.constant 9 : i32
    %60 = tpu.dynamic_rotate %27 by %c9_i32 dim 1 : vector<16x128xf32>, i32 -> vector<16x128xf32>
    %cst_21 = arith.constant 0.594603539 : f32
    %61 = vector.broadcast %cst_21 : f32 to vector<16x128xf32>
    %62 = arith.mulf %60, %61 : vector<16x128xf32>
    %63 = arith.addf %59, %62 : vector<16x128xf32>
    %c10_i32 = arith.constant 10 : i32
    %64 = tpu.dynamic_rotate %27 by %c10_i32 dim 1 : vector<16x128xf32>, i32 -> vector<16x128xf32>
    %cst_22 = arith.constant 5.612310e-01 : f32
    %65 = vector.broadcast %cst_22 : f32 to vector<16x128xf32>
    %66 = arith.mulf %64, %65 : vector<16x128xf32>
    %67 = arith.addf %63, %66 : vector<16x128xf32>
    %c11_i32 = arith.constant 11 : i32
    %68 = tpu.dynamic_rotate %27 by %c11_i32 dim 1 : vector<16x128xf32>, i32 -> vector<16x128xf32>
    %cst_23 = arith.constant 0.529731572 : f32
    %69 = vector.broadcast %cst_23 : f32 to vector<16x128xf32>
    %70 = arith.mulf %68, %69 : vector<16x128xf32>
    %71 = arith.addf %67, %70 : vector<16x128xf32>
    %72 = vector.extract_strided_slice %71 {offsets = [0, 0], sizes = [8, 128], strides = [1, 1]} : vector<16x128xf32> to vector<8x128xf32>
    %73 = vector.extract_strided_slice %71 {offsets = [8, 0], sizes = [8, 128], strides = [1, 1]} : vector<16x128xf32> to vector<8x128xf32>
    %cst_24 = arith.constant 9.99999997E-7 : f32
    %74 = vector.broadcast %cst_24 : f32 to vector<8x128xf32>
    %75 = arith.maximumf %73, %74 : vector<8x128xf32>
    %76 = tpu.reciprocal %75 {approx = true} : vector<8x128xf32> -> vector<8x128xf32>
    %cst_25 = arith.constant 0.000000e+00 : f32
    %77 = vector.broadcast %cst_25 : f32 to vector<8x128xf32>
    %78 = arith.cmpf ogt, %73, %77 : vector<8x128xf32>
    %79 = arith.mulf %72, %76 : vector<8x128xf32>
    %cst_26 = arith.constant 5.000000e-01 : f32
    %80 = vector.broadcast %cst_26 : f32 to vector<8x128xf32>
    %81 = arith.select %78, %79, %80 : vector<8x128xi1>, vector<8x128xf32>
    %c0_27 = arith.constant 0 : index
    %c0_28 = arith.constant 0 : index
    %82 = vector.load %arg2[%c0_27, %c0_28] : memref<8x128xf32, #tpu.memory_space<vmem>>, vector<8x128xf32>
    tpu.vector_store %arg2[%c0_27, %c0_28], %81 {strides = array<i32>} : memref<8x128xf32, #tpu.memory_space<vmem>>, vector<8x128xf32>,
    return
  }
  func.func @transform_0(%arg0: i32) -> (i32, i32, i32) {
    %c0_i32 = arith.constant 0 : i32
    %c0_i32_0 = arith.constant 0 : i32
    %c0_i32_1 = arith.constant 0 : i32
    return %arg0, %c0_i32, %c0_i32_0 : i32, i32, i32
  }
  func.func @transform_1(%arg0: i32) -> (i32, i32) {
    %c0_i32 = arith.constant 0 : i32
    %c0_i32_0 = arith.constant 0 : i32
    return %arg0, %c0_i32 : i32, i32
  }
}

</mosaic_0001>

<bundles_post_ra>
// kernel: tpu_custom_call.1
= control target key start
LH: loop header
LB: loop body
LE: loop exit
PB: predicated region body
PF: predicated region fallthrough
CT: control target
= control target key end

     0   :  { %v700_v26 = vmov 0.0   ;;  %v1404_v36 = vmov 0  ;;  %v1409_v42 = vmov 0  ;;  %v1413_v46 = vmov 0  ;;  %s1362_s0 = inlined_call_operand.vmem [shape: f32[8,20,128], index: 0, kind: input, shape index: {}]   ;;  %s1363_s1 = inlined_call_operand.hbm [shape: f32[8,128], index: 1, kind: output, shape index: {}]  }
   0x1   :  { %v726_v0 = vld [vmem:[%s1362_s0] sm:$0xff]  ;;  %v731_v1 = vld [vmem:[%s1362_s0 + $0x8] sm:$0xff]  ;;  %v736_v2 = vld [vmem:[%s1362_s0 + $0x10] sm:$0xf]  ;;  %v1417_v51 = vmov 0  ;;  %v1422_v54 = vmov 0 }
   0x2   :  { %v741_v3 = vld [vmem:[%s1362_s0 + $0x18] sm:$0xff]  ;;  %v746_v4 = vld [vmem:[%s1362_s0 + $0x20] sm:$0xff]  ;;  %v751_v5 = vld [vmem:[%s1362_s0 + $0x28] sm:$0xf]  ;;  %vm33_vm1 = vcmp.ge.f32.partialorder %v726_v0, 0.0  ;;  %vm34_vm2 = vcmp.ge.f32.partialorder %v731_v1, 0.0 }
   0x3   :  { %v756_v6 = vld [vmem:[%s1362_s0 + $0x30] sm:$0xff]  ;;  %v761_v7 = vld [vmem:[%s1362_s0 + $0x38] sm:$0xff]  ;;  %v766_v8 = vld [vmem:[%s1362_s0 + $0x40] sm:$0xf]  ;;  %vm35_vm3 = vcmp.ge.f32.partialorder %v736_v2, 0.0  ;;  %vm36_vm4 = vcmp.ge.f32.partialorder %v741_v3, 0.0 }
   0x4   :  { %v774_v9 = vld [vmem:[%s1362_s0 + $0x48] sm:$0xff]  ;;  %v779_v10 = vld [vmem:[%s1362_s0 + $0x50] sm:$0xff]  ;;  %v784_v11 = vld [vmem:[%s1362_s0 + $0x58] sm:$0xf]  ;;  %vm37_vm5 = vcmp.ge.f32.partialorder %v746_v4, 0.0  ;;  %vm38_vm6 = vcmp.ge.f32.partialorder %v751_v5, 0.0 }
   0x5   :  { %v791_v12 = vld [vmem:[%s1362_s0 + $0x60] sm:$0xff]  ;;  %v796_v13 = vld [vmem:[%s1362_s0 + $0x68] sm:$0xff]  ;;  %vm57_vm8 = vcmp.le.f32.partialorder %v726_v0, 1.0  ;;  %vm58_vm9 = vcmp.le.f32.partialorder %v731_v1, 1.0  ;;  %v805_v14 = vld [vmem:[%s1362_s0 + $0x70] sm:$0xf] }
   0x6   :  { %vm59_vm12 = vcmp.le.f32.partialorder %v736_v2, 1.0  ;;  %vm60_vm13 = vcmp.le.f32.partialorder %v741_v3, 1.0  ;;  %vm813_vm14 = vmand %vm33_vm1, %vm57_vm8  ;;  %v820_v16 = vld [vmem:[%s1362_s0 + $0x78] sm:$0xff]  ;;  %vm61_vm10 = vcmp.le.f32.partialorder %v746_v4, 1.0  ;;  %v835_v18 = vld [vmem:[%s1362_s0 + $0x80] sm:$0xff]  ;;  %vm62_vm0 = vcmp.le.f32.partialorder %v751_v5, 1.0 }
   0x7   :  { %vm828_vm7 = vmand %vm34_vm2, %vm58_vm9  ;;  %v850_v20 = vld [vmem:[%s1362_s0 + $0x88] sm:$0xf]  ;;  %vm64_vm9 = vcmp.le.f32.partialorder %v761_v7, 1.0  ;;  %v868_v22 = vld [vmem:[%s1362_s0 + $0x90] sm:$0xff]  ;;  %v637_v27 = vsel %vm813_vm14, 1.0, %v700_v26  ;;  %vm1407_vm11 = vcmp.le.f32.partialorder %v766_v8, 1.0 }
   0x8   :  { %vm843_vm15 = vmand %vm35_vm3, %vm59_vm12  ;;  %v886_v24 = vld [vmem:[%s1362_s0 + $0x98] sm:$0xff]  ;;  %v638_v28 = vsel %vm828_vm7, 1.0, %v700_v26  ;;  %v908_v29 = vld [vmem:[%s1362_s0 + $0xa0] sm:$0xf]  ;;  %vm1408_vm12 = vcmp.ge.f32.partialorder %v766_v8, 0.0  ;;  %vm1415_vm2 = vcmp.le.f32.partialorder %v779_v10, 1.0 }
   0x9   :  { %vm861_vm3 = vmand %vm36_vm4, %vm60_vm13  ;;  %v639_v31 = vsel %vm843_vm15, 1.0, %v700_v26  ;;  %v935_v35 = vld [vmem:[%s1362_s0 + $0xa8] sm:$0xff]  ;;  %v418_v38 = vadd.f32 %v638_v28, %v637_v27  ;;  %v953_v41 = vld [vmem:[%s1362_s0 + $0xb0] sm:$0xff]  ;;  %v1426_v59 = vmov 0  ;;  %v1430_v62 = vmov 0 }
   0xa   :  { %vm879_vm4 = vmand %vm37_vm5, %vm61_vm10  ;;  %vm1400_vm10 = vcmp.ge.f32.partialorder %v756_v6, 0.0  ;;  %v640_v32 = vsel %vm861_vm3, 1.0, %v700_v26  ;;  %v973_v45 = vld [vmem:[%s1362_s0 + $0xb8] sm:$0xf] }
   0xb   :  { %vm895_vm8 = vmand %vm38_vm6, %vm62_vm0  ;;  %vm1399_vm6 = vcmp.le.f32.partialorder %v756_v6, 1.0  ;;  %v641_v33 = vsel %vm879_vm4, 1.0, %v700_v26  ;;  %vm1406_vm0 = vcmask 1043456  }
   0xc   :  { %vm916_vm13 = vmand %vm1400_vm10, %vm1399_vm6  ;;  %v642_v34 = vsel %vm895_vm8, 1.0, %v700_v26  ;;  %vm1403_vm10 = vcmp.ge.f32.partialorder %v761_v7, 0.0  ;;  %v419_v39 = vsel %vm1406_vm0, %v639_v31, 0.0  ;;  %v427_v40 = vadd.f32 %v641_v33, %v640_v32 }
   0xd   :  { %vm942_vm5 = vmand %vm1403_vm10, %vm64_vm9  ;;  %v643_v37 = vsel %vm916_vm13, 1.0, %v700_v26  ;;  %v428_v44 = vsel %vm1406_vm0, %v642_v34, 0.0  ;;  %vm1411_vm10 = vcmp.le.f32.partialorder %v774_v9, 1.0  ;;  %v420_v48 = vadd.f32 %v419_v39, %v418_v38 }
   0xe   :  { %v1405_v36 = vsel %vm942_vm5, 4294967295, %v1404_v36  ;;  %vm962_vm1 = vmand %vm1408_vm12, %vm1407_vm11  ;;  %v644_v43 = vsel %vm942_vm5, 1.0, %v700_v26  ;;  %vm1412_vm11 = vcmp.ge.f32.partialorder %v774_v9, 0.0  ;;  %v429_v49 = vadd.f32 %v428_v44, %v427_v40 }
   0xf   :  { %v1410_v42 = vsel %vm962_vm1, 4294967295, %v1409_v42  ;;  %vm980_vm12 = vmand %vm1412_vm11, %vm1411_vm10  ;;  %v645_v47 = vsel %vm962_vm1, 1.0, %v700_v26  ;;  %v436_v50 = vadd.f32 %v644_v43, %v643_v37  ;;  %vm1416_vm10 = vcmp.ge.f32.partialorder %v779_v10, 0.0 }
  0x10   :  { %v1414_v46 = vsel %vm980_vm12, 4294967295, %v1413_v46  ;;  %vm994_vm11 = vmand %vm1416_vm10, %vm1415_vm2  ;;  %v646_v52 = vsel %vm980_vm12, 1.0, %v700_v26  ;;  %vm1420_vm9 = vcmp.le.f32.partialorder %v784_v11, 1.0  ;;  %vm1421_vm6 = vcmp.ge.f32.partialorder %v784_v11, 0.0 }
  0x11   :  { %v1418_v51 = vsel %vm994_vm11, 4294967295, %v1417_v51  ;;  %vm1419_vm1 = vmmov %vm1406_vm0  ;;  %v647_v55 = vsel %vm994_vm11, 1.0, %v700_v26  ;;  %v421_v56 = vrot.slane %v420_v48, 4  ;;  %v430_v57 = vrot.slane %v429_v49, 4 }
  0x12   :  { %v437_v53 = vsel %vm1419_vm1, %v645_v47, 0.0  ;;  %vm1007_vm5 = vmand %vm1421_vm6, %vm1420_vm9  ;;  %vm1424_vm0 = vcmp.le.f32.partialorder %v791_v12, 1.0  ;;  %vm1425_vm6 = vcmp.ge.f32.partialorder %v791_v12, 0.0  ;;  %v445_v61 = vadd.f32 %v647_v55, %v646_v52 }
  0x13   :  { %v1423_v54 = vsel %vm1007_vm5, 4294967295, %v1422_v54  ;;  %v438_v58 = vadd.f32 %v437_v53, %v436_v50  ;;  %vm1021_vm9 = vmand %vm1425_vm6, %vm1424_vm0  ;;  %v648_v60 = vsel %vm1007_vm5, 1.0, %v700_v26  ;;  %vm1428_vm11 = vcmp.le.f32.partialorder %v796_v13, 1.0 }
  0x14   :  { %v1427_v59 = vsel %vm1021_vm9, 4294967295, %v1426_v59  ;;  %vm1429_vm2 = vcmp.ge.f32.partialorder %v796_v13, 0.0  ;;  %v649_v63 = vsel %vm1021_vm9, 1.0, %v700_v26  ;;  %v422_v27 = vadd.f32 %v421_v56, %v420_v48 }
  0x15   :  { %vm1032_vm1 = vmand %vm1429_vm2, %vm1428_vm11  ;;  %v431_v28 = vadd.f32 %v430_v57, %v429_v49  ;;  %v439_v31 = vrot.slane %v438_v58, 4  ;;  %vm1433_vm0 = vcmp.le.f32.partialorder %v805_v14, 1.0  ;;  %vm1434_vm6 = vcmp.ge.f32.partialorder %v805_v14, 0.0 }
  0x16   :  { %v1431_v62 = vsel %vm1032_vm1, 4294967295, %v1430_v62  ;;  %vm1043_vm10 = vmand %vm1434_vm6, %vm1433_vm0  ;;  %v1435_v32 = vmov 0  ;;  %v650_v33 = vsel %vm1032_vm1, 1.0, %v700_v26  ;;  %vm1438_vm11 = vcmask 1043456  }
  0x17   :  { %1432 = vst [vmem:[#allocation5_spill] sm:$0xff] %v1431_v62  ;;  %v1436_v32 = vsel %vm1043_vm10, 4294967295, %v1435_v32  ;;  %v446_v34 = vsel %vm1438_vm11, %v648_v60, 0.0  ;;  %v1052_v37 = vmul.f32 400.0, %v726_v0  ;;  %vm1439_vm9 = vcmp.le.f32.partialorder %v820_v16, 1.0 }
  0x18   :  { %1437 = vst [vmem:[#allocation6_spill] sm:$0xff] %v1436_v32  ;;  %vm1440_vm5 = vcmp.ge.f32.partialorder %v820_v16, 0.0  ;;  %v1441_v38 = vmov 0  ;;  %v651_v39 = vsel %vm1043_vm10, 1.0, %v700_v26  ;;  %v423_v40 = vrot.slane %v422_v27, 2 }
  0x19   :  { %vm1058_vm12 = vmand %vm1440_vm5, %vm1439_vm9  ;;  %v432_v43 = vrot.slane %v431_v28, 2  ;;  %v440_v44 = vadd.f32 %v439_v31, %v438_v58  ;;  %vm1444_vm6 = vcmp.le.f32.partialorder %v835_v18, 1.0  ;;  %vm1445_vm11 = vcmp.ge.f32.partialorder %v835_v18, 0.0 }
  0x1a   :  { %v1442_v38 = vsel %vm1058_vm12, 4294967295, %v1441_v38  ;;  %vm1069_vm2 = vmand %vm1445_vm11, %vm1444_vm6  ;;  %v1446_v0 = vmov 0  ;;  %v652_v47 = vsel %vm1058_vm12, 1.0, %v700_v26  ;;  %v447_v48 = vadd.f32 %v446_v34, %v445_v61 }
  0x1b   :  { %1443 = vst [vmem:[#allocation7_spill] sm:$0xff] %v1442_v38  ;;  %v1447_v0 = vsel %vm1069_vm2, 4294967295, %v1446_v0  ;;  %v454_v49 = vadd.f32 %v650_v33, %v649_v63  ;;  %vm1449_vm5 = vcmask 1043456   ;;  %vm1450_vm9 = vcmp.le.f32.partialorder %v850_v20, 1.0 }
  0x1c   :  { %1448 = vst [vmem:[#allocation8_spill] sm:$0xff] %v1447_v0  ;;  %v455_v50 = vsel %vm1449_vm5, %v651_v39, 0.0  ;;  %vm1451_vm0 = vcmp.ge.f32.partialorder %v850_v20, 0.0  ;;  %v1452_v52 = vmov 0  ;;  %v653_v53 = vsel %vm1069_vm2, 1.0, %v700_v26 }
  0x1d   :  { %vm1081_vm10 = vmand %vm1451_vm0, %vm1450_vm9  ;;  %v424_v55 = vadd.f32 %v423_v40, %v422_v27  ;;  %v433_v56 = vadd.f32 %v432_v43, %v431_v28  ;;  %v441_v57 = vrot.slane %v440_v44, 2  ;;  %vm1455_vm6 = vcmp.le.f32.partialorder %v868_v22, 1.0 }
  0x1e   :  { %v1453_v52 = vsel %vm1081_vm10, 4294967295, %v1452_v52  ;;  %vm1456_vm11 = vcmp.ge.f32.partialorder %v868_v22, 0.0  ;;  %v1457_v58 = vmov 0  ;;  %v654_v60 = vsel %vm1081_vm10, 1.0, %v700_v26 }
  0x1f   :  { %1454 = vst [vmem:[#allocation9_spill] sm:$0xff] %v1453_v52  ;;  %vm1092_vm5 = vmand %vm1456_vm11, %vm1455_vm6  ;;  %v448_v61 = vrot.slane %v447_v48, 4  ;;  %v456_v63 = vadd.f32 %v455_v50, %v454_v49  ;;  %v463_v31 = vadd.f32 %v653_v53, %v652_v47  ;;  %vm1460_vm0 = vcmp.le.f32.partialorder %v886_v24, 1.0 }
  0x20   :  { %v1458_v58 = vsel %vm1092_vm5, 4294967295, %v1457_v58  ;;  %vm1461_vm9 = vcmp.ge.f32.partialorder %v886_v24, 0.0  ;;  %v1462_v27 = vmov 0  ;;  %v655_v28 = vsel %vm1092_vm5, 1.0, %v700_v26 }
  0x21   :  { %1459 = vst [vmem:[#allocation10_spill] sm:$0xff] %v1458_v58  ;;  %vm1103_vm2 = vmand %vm1461_vm9, %vm1460_vm0  ;;  %v425_v33 = vrot.slane %v424_v55, 1  ;;  %v434_v34 = vrot.slane %v433_v56, 1  ;;  %v442_v39 = vadd.f32 %v441_v57, %v440_v44  ;;  %vm1465_vm11 = vcmp.le.f32.partialorder %v908_v29, 1.0 }
  0x22   :  { %v1463_v27 = vsel %vm1103_vm2, 4294967295, %v1462_v27  ;;  %vm1466_vm10 = vcmp.ge.f32.partialorder %v908_v29, 0.0  ;;  %v1467_v40 = vmov 0  ;;  %v656_v43 = vsel %vm1103_vm2, 1.0, %v700_v26 }
  0x23   :  { %1464 = vst [vmem:[#allocation11_spill] sm:$0xff] %v1463_v27  ;;  %vm1114_vm12 = vmand %vm1466_vm10, %vm1465_vm11  ;;  %v449_v47 = vadd.f32 %v448_v61, %v447_v48  ;;  %v457_v49 = vrot.slane %v456_v63, 4  ;;  %vm1470_vm0 = vcmask 1043456   ;;  %vm1471_vm9 = vcmp.le.f32.partialorder %v935_v35, 1.0 }
  0x24   :  { %v1468_v40 = vsel %vm1114_vm12, 4294967295, %v1467_v40  ;;  %v464_v50 = vsel %vm1470_vm0, %v654_v60, 0.0  ;;  %vm1472_vm6 = vcmp.ge.f32.partialorder %v935_v35, 0.0  ;;  %v1473_v44 = vmov 0 }
  0x25   :  { %1469 = vst [vmem:[#allocation12_spill] sm:$0xff] %v1468_v40  ;;  %vm1126_vm5 = vmand %vm1472_vm6, %vm1471_vm9  ;;  %v657_v53 = vsel %vm1114_vm12, 1.0, %v700_v26  ;;  %v426_v57 = vadd.f32 %v425_v33, %v424_v55  ;;  %v435_v58 = vadd.f32 %v434_v34, %v433_v56  ;;  %v443_v27 = vrot.slane %v442_v39, 1 }
  0x26   :  { %v1474_v44 = vsel %vm1126_vm5, 4294967295, %v1473_v44  ;;  %vm1476_vm11 = vcmp.le.f32.partialorder %v953_v41, 1.0  ;;  %vm1477_vm0 = vcmp.ge.f32.partialorder %v953_v41, 0.0  ;;  %v1478_v48 = vmov 0 }
  0x27   :  { %1475 = vst [vmem:[#allocation13_spill] sm:$0xff] %v1474_v44  ;;  %vm1137_vm2 = vmand %vm1477_vm0, %vm1476_vm11  ;;  %v658_v60 = vsel %vm1126_vm5, 1.0, %v700_v26  ;;  %v450_v61 = vrot.slane %v449_v47, 2  ;;  %v458_v52 = vadd.f32 %v457_v49, %v456_v63  ;;  %v465_v40 = vadd.f32 %v464_v50, %v463_v31 }
  0x28   :  { %v1479_v48 = vsel %vm1137_vm2, 4294967295, %v1478_v48  ;;  %vm1481_vm6 = vcmp.le.f32.partialorder %v973_v45, 1.0  ;;  %vm1482_vm9 = vcmp.ge.f32.partialorder %v973_v45, 0.0  ;;  %v659_v56 = vsel %vm1137_vm2, 1.0, %v700_v26 }
  0x29   :  { %1480 = vst [vmem:[#allocation14_spill] sm:$0xff] %v1479_v48  ;;  %vm1148_vm10 = vmand %vm1482_vm9, %vm1481_vm6  ;;  %v444_v33 = vadd.f32 %v443_v27, %v442_v39  ;;  %v472_v34 = vadd.f32 %v656_v43, %v655_v28  ;;  %vm1485_vm11 = vcmask 1043456   ;;  %v451_v31 = vadd.f32 %v450_v61, %v449_v47 }
  0x2a   :  { %v473_v44 = vsel %vm1485_vm11, %v657_v53, 0.0  ;;  %v660_v63 = vsel %vm1148_vm10, 1.0, %v700_v26  ;;  %v459_v49 = vrot.slane %v458_v52, 2  ;;  %v466_v50 = vrot.slane %v465_v40, 4 }
  0x2b   :  { %6 = vsyncpa [#allocation3], 0  ;;  %v474_v0 = vadd.f32 %v473_v44, %v472_v34  ;;  %v481_v38 = vadd.f32 %v659_v56, %v658_v60  ;;  %vm506_vm6 = vcmask 1045509   ;;  %vm1487_vm9 = vcmask 1041409   ;;  %s701_s0 = smov 3   ;;  %s702_s25 = smov 1  }
  0x2c   :  { %vm1486_vm0 = vmmov %vm1485_vm11  ;;  %v521_v48 = vsel %vm1487_vm9, %v435_v58, %v426_v57  ;;  %v452_v62 = vrot.slane %v451_v31, 1  ;;  %v460_v27 = vadd.f32 %v459_v49, %v458_v52  ;;  %v467_v28 = vadd.f32 %v466_v50, %v465_v40  ;;  %s703_s26 = smov 4   ;;  %s704_s27 = smov 2  }
  0x2d   :  { %v482_v32 = vsel %vm1486_vm0, %v660_v63, 0.0  ;;  %vm1488_vm2 = vcmask 1042434   ;;  %v475_v43 = vrot.slane %v474_v0, 4  ;;  %v1163_v26 = vmul.f32 400.0, %v731_v1  ;;  %s705_s28 = smov 6   ;;  %s706_s29 = smov 5  }
  0x2e   :  { %v522_v39 = vsel %vm1488_vm2, %v444_v33, %v521_v48  ;;  %v483_v53 = vadd.f32 %v482_v32, %v481_v38  ;;  %v1166_v47 = vmul.f32 400.0, %v736_v2  ;;  %v453_v44 = vadd.f32 %v452_v62, %v451_v31  ;;  %s707_s30 = smov 7   ;;  %s708_s2 = smov 8  }
  0x2f   :  { %v461_v60 = vrot.slane %v460_v27, 1  ;;  %v468_v61 = vrot.slane %v467_v28, 2  ;;  %vm508_vm11 = vcmask 1046534   ;;  %v1169_v56 = vmul.f32 400.0, %v741_v3  ;;  %s709_s3 = smov 9   ;;  %s710_s4 = smov 10  }
  0x30   :  { %v476_v58 = vadd.f32 %v475_v43, %v474_v0  ;;  %v484_v52 = vrot.slane %v483_v53, 4  ;;  %v1172_v40 = vmul.f32 400.0, %v746_v4  ;;  %v1175_v32 = vmul.f32 400.0, %v751_v5  ;;  %s711_s5 = smov 11   ;;  %s712_s6 = smov [#allocation2]  }
  0x31   :  { %v462_v1 = vadd.f32 %v461_v60, %v460_v27  ;;  %v469_v38 = vadd.f32 %v468_v61, %v467_v28  ;;  %vm510_vm2 = vcmask 1047559   ;;  %vm1489_vm0 = vcmask 1043459   ;;  %s629_s7 = sshll.u32 %s712_s6, 4  ;;  %s630_s7 = int_to_ptr.vmem [resolvable:$true] %s629_s7 }
  0x32   :  { %v523_v2 = vsel %vm1489_vm0, %v453_v44, %v522_v39  ;;  %v1179_v62 = vmul.f32 400.0, %v756_v6  ;;  %v477_v57 = vrot.slane %v476_v58, 2  ;;  %v485_v48 = vadd.f32 %v484_v52, %v483_v53  ;;  %s676_s8 = scalar_lea.vmem %s630_s7, 128  ;;  %p681_p1 = scmp.lt.s32.totalorder %s630_s7, %s630_s7 }
  0x33   :  { %v1182_v3 = vmul.f32 400.0, %v761_v7  ;;  %v1185_v0 = vmul.f32 400.0, %v766_v8  ;;  %v470_v4 = vrot.slane %v469_v38, 1  ;;  %vm1490_vm9 = vcmask 1044484   ;;  %p677_p0 = scmp.ne.s32.totalorder %s630_s7, %s676_s8  ;;  %p682_p2 = scmp.lt.s32.totalorder %s676_s8, %s676_s8 }
  0x34   :  { %v524_v5 = vsel %vm1490_vm9, %v462_v1, %v523_v2  ;;  %v1189_v33 = vmul.f32 400.0, %v774_v9  ;;  %v1192_v34 = vmul.f32 400.0, %v779_v10  ;;  %v478_v63 = vadd.f32 %v477_v57, %v476_v58 }
  0x35   :  { %v486_v6 = vrot.slane %v485_v48, 2  ;;  %v1195_v31 = vmul.f32 400.0, %v784_v11  ;;  %v1198_v7 = vmul.f32 400.0, %v791_v12  ;;  %v471_v49 = vadd.f32 %v470_v4, %v469_v38  ;;  %p683_p3 = por %p682_p2, %p681_p1 }
  0x36   :  { %v1201_v8 = vmul.f32 400.0, %v796_v13  ;;  %v1204_v50 = vmul.f32 400.0, %v805_v14  ;;  %v1207_v9 = vmul.f32 400.0, %v820_v16  ;;  %v479_v10 = vrot.slane %v478_v63, 1 }
  0x37   :  { %v487_v27 = vadd.f32 %v486_v6, %v485_v48  ;;  %v121_v28 = vmul.f32 400.0, %v835_v18  ;;  %v122_v11 = vmul.f32 400.0, %v850_v20  ;;  %v525_v39 = vsel %vm506_vm6, %v471_v49, %v524_v5  ;;  %p684_p4 = pnand %p683_p3, %p677_p0 }
  0x38   :  { %v123_v12 = vmul.f32 400.0, %v868_v22  ;;  %v124_v43 = vmul.f32 400.0, %v886_v24  ;;  %v1215_v13 = vmul.f32 400.0, %v908_v29  ;;  %v480_v14 = vadd.f32 %v479_v10, %v478_v63 }
  0x39   :  { %v488_v53 = vrot.slane %v487_v27, 1  ;;  %v1218_v16 = vmul.f32 400.0, %v935_v35  ;;  %v1221_v44 = vmul.f32 400.0, %v953_v41  ;;  %v1224_v18 = vmul.f32 400.0, %v973_v45 }
  0x3a   :  { %v129_v20 = vfloor.f32 %v1052_v37  ;;  %v130_v22 = vfloor.f32 %v1163_v26  ;;  %v131_v24 = vfloor.f32 %v1166_v47  ;;  %v526_v29 = vsel %vm508_vm11, %v480_v14, %v525_v39 }
  0x3b   :  { %v489_v60 = vadd.f32 %v488_v53, %v487_v27  ;;  %v132_v61 = vfloor.f32 %v1169_v56  ;;  %v133_v35 = vfloor.f32 %v1172_v40  ;;  %v134_v58 = vfloor.f32 %v1175_v32 }
  0x3c   :  { %v135_v41 = vfloor.f32 %v1179_v62  ;;  %v136_v45 = vfloor.f32 %v1182_v3  ;;  %v137_v52 = vfloor.f32 %v1185_v0  ;;  %v138_v26 = vfloor.f32 %v1189_v33 }
  0x3d   :  { %v1237_v37 = vsel %vm510_vm2, %v489_v60, %v526_v29  ;;  %v139_v47 = vfloor.f32 %v1192_v34  ;;  %v140_v1 = vfloor.f32 %v1195_v31  ;;  %v141_v56 = vfloor.f32 %v1198_v7 }
  0x3e   :  { %547 = vrot.lane.b32.xlu1 %v1237_v37, %s701_s0  ;;  %531 = vrot.lane.b32.xlu0 %v1237_v37, %s702_s25  ;;  %v142_v40 = vfloor.f32 %v1201_v8  ;;  %v143_v32 = vfloor.f32 %v1204_v50  ;;  %v144_v38 = vfloor.f32 %v1207_v9  ;;  %v145_v2 = vfloor.f32 %v121_v28 }
  0x3f   :  { %v146_v62 = vfloor.f32 %v122_v11  ;;  %v147_v57 = vfloor.f32 %v123_v12  ;;  %v148_v48 = vfloor.f32 %v124_v43  ;;  %v149_v3 = vfloor.f32 %v1215_v13 }
  0x40   :  { %v150_v0 = vfloor.f32 %v1218_v16  ;;  %v151_v4 = vfloor.f32 %v1221_v44  ;;  %v152_v5 = vfloor.f32 %v1224_v18  ;;  %v153_v33 = vmax.f32 %v129_v20, 0.0 }
  0x41   :  { %v154_v34 = vmax.f32 %v130_v22, 0.0  ;;  %v155_v63 = vmax.f32 %v131_v24, 0.0  ;;  %v156_v6 = vmax.f32 %v132_v61, 0.0  ;;  %v157_v31 = vmax.f32 %v133_v35, 0.0 }
  0x42   :  { %555 = vrot.lane.b32.xlu1 %v1237_v37, %s703_s26  ;;  %539 = vrot.lane.b32.xlu0 %v1237_v37, %s704_s27  ;;  %v158_v7 = vmax.f32 %v134_v58, 0.0  ;;  %v159_v49 = vmax.f32 %v135_v41, 0.0  ;;  %v160_v8 = vmax.f32 %v136_v45, 0.0  ;;  %v161_v50 = vmax.f32 %v137_v52, 0.0 }
  0x43   :  { %v162_v9 = vmax.f32 %v138_v26, 0.0  ;;  %v163_v10 = vmax.f32 %v139_v47, 0.0  ;;  %v164_v27 = vmax.f32 %v140_v1, 0.0  ;;  %v165_v28 = vmax.f32 %v141_v56, 0.0 }
  0x44   :  { %v166_v11 = vmax.f32 %v142_v40, 0.0  ;;  %v167_v39 = vmax.f32 %v143_v32, 0.0  ;;  %v168_v12 = vmax.f32 %v144_v38, 0.0  ;;  %v169_v43 = vmax.f32 %v145_v2, 0.0 }
  0x45   :  { %v170_v13 = vmax.f32 %v146_v62, 0.0  ;;  %v171_v14 = vmax.f32 %v147_v57, 0.0  ;;  %v172_v53 = vmax.f32 %v148_v48, 0.0  ;;  %v173_v16 = vmax.f32 %v149_v3, 0.0 }
  0x46   :  { %571 = vrot.lane.b32.xlu1 %v1237_v37, %s705_s28  ;;  %563 = vrot.lane.b32.xlu0 %v1237_v37, %s706_s29  ;;  %v174_v44 = vmax.f32 %v150_v0, 0.0  ;;  %v175_v18 = vmax.f32 %v151_v4, 0.0  ;;  %v176_v20 = vmax.f32 %v152_v5, 0.0  ;;  %v177_v22 = vmin.f32 %v153_v33, 399.0 }
  0x47   :  { %v178_v24 = vmin.f32 %v154_v34, 399.0  ;;  %v179_v60 = vmin.f32 %v155_v63, 399.0  ;;  %v180_v29 = vmin.f32 %v156_v6, 399.0  ;;  %v181_v61 = vmin.f32 %v157_v31, 399.0 }
  0x48   :  { %v182_v35 = vmin.f32 %v158_v7, 399.0  ;;  %v183_v58 = vmin.f32 %v159_v49, 399.0  ;;  %v184_v41 = vmin.f32 %v160_v8, 399.0  ;;  %v185_v45 = vmin.f32 %v161_v50, 399.0 }
  0x49   :  { %v186_v52 = vmin.f32 %v162_v9, 399.0  ;;  %v187_v26 = vmin.f32 %v163_v10, 399.0  ;;  %v188_v47 = vmin.f32 %v164_v27, 399.0  ;;  %v189_v1 = vmin.f32 %v165_v28, 399.0 }
  0x4a   :  { %579 = vrot.lane.b32.xlu0 %v1237_v37, %s707_s30  ;;  %v190_v56 = vmin.f32 %v166_v11, 399.0  ;;  %v191_v40 = vmin.f32 %v167_v39, 399.0  ;;  %v192_v32 = vmin.f32 %v168_v12, 399.0  ;;  %v193_v38 = vmin.f32 %v169_v43, 399.0 }
  0x4b   :  { %v194_v2 = vmin.f32 %v170_v13, 399.0  ;;  %v195_v62 = vmin.f32 %v171_v14, 399.0  ;;  %v196_v57 = vmin.f32 %v172_v53, 399.0  ;;  %v197_v48 = vmin.f32 %v173_v16, 399.0 }
  0x4c   :  { %v198_v3 = vmin.f32 %v174_v44, 399.0  ;;  %v199_v0 = vmin.f32 %v175_v18, 399.0  ;;  %v200_v4 = vmin.f32 %v176_v20, 399.0  ;;  %v201_v5 = vadd.f32 1.0, %v177_v22 }
  0x4d   :  { %v202_v33 = vadd.f32 1.0, %v178_v24  ;;  %v203_v34 = vadd.f32 1.0, %v179_v60  ;;  %v204_v63 = vadd.f32 1.0, %v180_v29  ;;  %v205_v6 = vadd.f32 1.0, %v181_v61 }
  0x4e   :  { %v206_v31 = vadd.f32 1.0, %v182_v35  ;;  %v207_v7 = vadd.f32 1.0, %v183_v58  ;;  %v208_v49 = vadd.f32 1.0, %v184_v41  ;;  %587 = vrot.lane.b32.xlu0 %v1237_v37, %s708_s2  ;;  %v209_v8 = vadd.f32 1.0, %v185_v45 }
  0x4f   :  { %v210_v50 = vadd.f32 1.0, %v186_v52  ;;  %v211_v9 = vadd.f32 1.0, %v187_v26  ;;  %v212_v10 = vadd.f32 1.0, %v188_v47  ;;  %v213_v27 = vadd.f32 1.0, %v189_v1 }
  0x50   :  { %v214_v28 = vadd.f32 1.0, %v190_v56  ;;  %v215_v11 = vadd.f32 1.0, %v191_v40  ;;  %v216_v39 = vadd.f32 1.0, %v192_v32  ;;  %v217_v12 = vadd.f32 1.0, %v193_v38 }
  0x51   :  { %v218_v43 = vadd.f32 1.0, %v194_v2  ;;  %v219_v13 = vadd.f32 1.0, %v195_v62  ;;  %v220_v14 = vadd.f32 1.0, %v196_v57  ;;  %v221_v53 = vadd.f32 1.0, %v197_v48 }
  0x52   :  { %v222_v16 = vadd.f32 1.0, %v198_v3  ;;  %v223_v44 = vadd.f32 1.0, %v199_v0  ;;  %v224_v18 = vadd.f32 1.0, %v200_v4  ;;  %595 = vrot.lane.b32.xlu0 %v1237_v37, %s709_s3  ;;  %v225_v20 = vmul.f32 0.0025, %v201_v5 }
  0x53   :  { %v226_v22 = vmul.f32 0.0025, %v202_v33  ;;  %v227_v24 = vmul.f32 0.0025, %v203_v34  ;;  %v228_v60 = vmul.f32 0.0025, %v204_v63 }
  0x54   :  { %v229_v29 = vmul.f32 0.0025, %v205_v6  ;;  %v230_v61 = vmul.f32 0.0025, %v206_v31  ;;  %v231_v35 = vmul.f32 0.0025, %v207_v7 }
  0x55   :  { %v232_v58 = vmul.f32 0.0025, %v208_v49  ;;  %v233_v41 = vmul.f32 0.0025, %v209_v8  ;;  %v234_v45 = vmul.f32 0.0025, %v210_v50 }
  0x56   :  { %v235_v52 = vmul.f32 0.0025, %v211_v9  ;;  %v236_v26 = vmul.f32 0.0025, %v212_v10  ;;  %603 = vrot.lane.b32.xlu0 %v1237_v37, %s710_s4  ;;  %v237_v47 = vmul.f32 0.0025, %v213_v27 }
  0x57   :  { %v238_v1 = vmul.f32 0.0025, %v214_v28  ;;  %v239_v56 = vmul.f32 0.0025, %v215_v11  ;;  %v240_v40 = vmul.f32 0.0025, %v216_v39 }
  0x58   :  { %v241_v32 = vmul.f32 0.0025, %v217_v12  ;;  %v242_v38 = vmul.f32 0.0025, %v218_v43  ;;  %v243_v2 = vmul.f32 0.0025, %v219_v13 }
  0x59   :  { %v244_v62 = vmul.f32 0.0025, %v220_v14  ;;  %v245_v57 = vmul.f32 0.0025, %v221_v53  ;;  %v246_v48 = vmul.f32 0.0025, %v222_v16 }
  0x5a   :  { %v247_v3 = vmul.f32 0.0025, %v223_v44  ;;  %v1270_v0 = vmul.f32 0.0025, %v224_v18  ;;  %611 = vrot.lane.b32.xlu0 %v1237_v37, %s711_s5  ;;  %v273_v4 = vsel %vm813_vm14, %v225_v20, 0.0  ;;  %v274_v5 = vsel %vm828_vm7, %v226_v22, 0.0 }
  0x5b   :  { %v275_v33 = vsel %vm843_vm15, %v227_v24, 0.0  ;;  %v276_v34 = vsel %vm861_vm3, %v228_v60, 0.0  ;;  %v277_v63 = vsel %vm879_vm4, %v229_v29, 0.0  ;;  %v278_v6 = vsel %vm895_vm8, %v230_v61, 0.0  ;;  %v1512_v43 = vld [vmem:[#allocation14_spill] sm:$0xff] }
  0x5c   :  { %v279_v31 = vsel %vm916_vm13, %v231_v35, 0.0  ;;  %vm1491_vm14 = vnez %v1405_v36  ;;  %vm1492_vm7 = vnez %v1410_v42  ;;  %vm1493_vm15 = vnez %v1414_v46  ;;  %v1498_v36 = vld [vmem:[#allocation6_spill] sm:$0xff]  ;;  %v1500_v42 = vld [vmem:[#allocation7_spill] sm:$0xff]  ;;  %v1502_v46 = vld [vmem:[#allocation8_spill] sm:$0xff] }
  0x5d   :  { %v280_v15 = vsel %vm1491_vm14, %v232_v58, 0.0  ;;  %v281_v17 = vsel %vm1492_vm7, %v233_v41, 0.0  ;;  %v282_v19 = vsel %vm1493_vm15, %v234_v45, 0.0  ;;  %vm1494_vm3 = vnez %v1418_v51  ;;  %v1504_v51 = vld [vmem:[#allocation9_spill] sm:$0xff] }
  0x5e   :  { %v283_v21 = vsel %vm1494_vm3, %v235_v52, 0.0  ;;  %vm1495_vm4 = vnez %v1423_v54  ;;  %vm1496_vm8 = vnez %v1427_v59  ;;  %v286_v7 = vsel %vm1032_vm1, %v238_v1, 0.0  ;;  %v1506_v54 = vld [vmem:[#allocation10_spill] sm:$0xff]  ;;  %v1508_v59 = vld [vmem:[#allocation11_spill] sm:$0xff] }
  0x5f   :  { %v284_v23 = vsel %vm1495_vm4, %v236_v26, 0.0  ;;  %v285_v25 = vsel %vm1496_vm8, %v237_v47, 0.0  ;;  %vm1499_vm13 = vnez %v1498_v36  ;;  %vm1501_vm0 = vnez %v1500_v42 }
  0x60   :  { %v287_v49 = vsel %vm1499_vm13, %v239_v56, 0.0  ;;  %v288_v8 = vsel %vm1501_vm0, %v240_v40, 0.0  ;;  %vm1503_vm9 = vnez %v1502_v46  ;;  %vm1505_vm14 = vnez %v1504_v51 }
  0x61   :  { %v289_v50 = vsel %vm1503_vm9, %v241_v32, 0.0  ;;  %v290_v9 = vsel %vm1505_vm14, %v242_v38, 0.0  ;;  %vm1507_vm7 = vnez %v1506_v54  ;;  %vm1509_vm15 = vnez %v1508_v59 }
  0x62   :  { %v291_v10 = vsel %vm1507_vm7, %v243_v2, 0.0  ;;  %v292_v27 = vsel %vm1509_vm15, %v244_v62, 0.0  ;;  %v293_v11 = vsel %vm1114_vm12, %v245_v57, 0.0  ;;  %v294_v12 = vsel %vm1126_vm5, %v246_v48, 0.0 }
  0x63   :  { %vm1513_vm1 = vnez %v1512_v43  ;;  %v296_v14 = vsel %vm1148_vm10, %v1270_v0, 0.0  ;;  %v345_v53 = vadd.f32 %v274_v5, %v273_v4  ;;  %vm1514_vm3 = vcmask 1043456  }
  0x64   :  { %v295_v13 = vsel %vm1513_vm1, %v247_v3, 0.0  ;;  %v347_v16 = vsel %vm1514_vm3, %v275_v33, 0.0  ;;  %v355_v44 = vadd.f32 %v277_v63, %v276_v34  ;;  %vm1515_vm4 = vmmov %vm1514_vm3  ;;  %v364_v20 = vadd.f32 %v280_v15, %v279_v31 }
  0x65   :  { %v356_v18 = vsel %vm1515_vm4, %v278_v6, 0.0  ;;  %vm1516_vm8 = vmmov %vm1514_vm3  ;;  %v373_v24 = vadd.f32 %v283_v21, %v282_v19  ;;  %v348_v29 = vadd.f32 %v347_v16, %v345_v53  ;;  %v382_v35 = vadd.f32 %v286_v7, %v285_v25 }
  0x66   :  { %v365_v22 = vsel %vm1516_vm8, %v281_v17, 0.0  ;;  %vm1517_vm12 = vmmov %vm1514_vm3  ;;  %v357_v61 = vadd.f32 %v356_v18, %v355_v44  ;;  %v391_v45 = vadd.f32 %v289_v50, %v288_v8  ;;  %v400_v56 = vadd.f32 %v292_v27, %v291_v10 }
  0x67   :  { %v374_v60 = vsel %vm1517_vm12, %v284_v23, 0.0  ;;  %vm1518_vm5 = vmmov %vm1514_vm3  ;;  %v366_v41 = vadd.f32 %v365_v22, %v364_v20  ;;  %v349_v26 = vrot.slane %v348_v29, 4  ;;  %v409_v33 = vadd.f32 %v295_v13, %v294_v12 }
  0x68   :  { %v383_v58 = vsel %vm1518_vm5, %v287_v49, 0.0  ;;  %v375_v55 = vadd.f32 %v374_v60, %v373_v24  ;;  %vm1519_vm10 = vmmov %vm1514_vm3  ;;  %v358_v47 = vrot.slane %v357_v61, 4  ;;  %vm1522_vm9 = vcmask 1041409  }
  0x69   :  { %v392_v52 = vsel %vm1519_vm10, %v290_v9, 0.0  ;;  %v384_v1 = vadd.f32 %v383_v58, %v382_v35  ;;  %v367_v40 = vrot.slane %v366_v41, 4  ;;  %vm1520_vm13 = vmmov %vm1514_vm3  ;;  %v350_v62 = vadd.f32 %v349_v26, %v348_v29 }
  0x6a   :  { %v376_v32 = vrot.slane %v375_v55, 4  ;;  %v393_v38 = vadd.f32 %v392_v52, %v391_v45  ;;  %v401_v2 = vsel %vm1520_vm13, %v293_v11, 0.0  ;;  %v359_v57 = vadd.f32 %v358_v47, %v357_v61  ;;  %vm1521_vm0 = vmmov %vm1514_vm3 }
  0x6b   :  { %v385_v48 = vrot.slane %v384_v1, 4  ;;  %v402_v3 = vadd.f32 %v401_v2, %v400_v56  ;;  %v368_v0 = vadd.f32 %v367_v40, %v366_v41  ;;  %v351_v34 = vrot.slane %v350_v62, 2 }
  0x6c   :  { %v377_v4 = vadd.f32 %v376_v32, %v375_v55  ;;  %v394_v5 = vrot.slane %v393_v38, 4  ;;  %v360_v63 = vrot.slane %v359_v57, 2  ;;  %v410_v21 = vsel %vm1521_vm0, %v296_v14, 0.0 }
  0x6d   :  { %v386_v6 = vadd.f32 %v385_v48, %v384_v1  ;;  %v403_v31 = vrot.slane %v402_v3, 4  ;;  %v369_v15 = vrot.slane %v368_v0, 2  ;;  %v352_v23 = vadd.f32 %v351_v34, %v350_v62 }
  0x6e   :  { %v378_v17 = vrot.slane %v377_v4, 2  ;;  %v395_v19 = vadd.f32 %v394_v5, %v393_v38  ;;  %v361_v25 = vadd.f32 %v360_v63, %v359_v57  ;;  %v411_v8 = vadd.f32 %v410_v21, %v409_v33 }
  0x6f   :  { %v387_v30 = vrot.slane %v386_v6, 2  ;;  %v404_v7 = vadd.f32 %v403_v31, %v402_v3  ;;  %v370_v36 = vadd.f32 %v369_v15, %v368_v0  ;;  %v353_v46 = vrot.slane %v352_v23, 1 }
  0x70   :  { %v379_v49 = vadd.f32 %v378_v17, %v377_v4  ;;  %v396_v42 = vrot.slane %v395_v19, 2  ;;  %v362_v50 = vrot.slane %v361_v25, 1  ;;  %v412_v27 = vrot.slane %v411_v8, 4 }
  0x71   :  { %v388_v51 = vadd.f32 %v387_v30, %v386_v6  ;;  %v405_v9 = vrot.slane %v404_v7, 2  ;;  %v371_v54 = vrot.slane %v370_v36, 1  ;;  %v354_v28 = vadd.f32 %v353_v46, %v352_v23 }
  0x72   :  { %v380_v10 = vrot.slane %v379_v49, 1  ;;  %v397_v59 = vadd.f32 %v396_v42, %v395_v19  ;;  %v363_v11 = vadd.f32 %v362_v50, %v361_v25  ;;  %v413_v53 = vadd.f32 %v412_v27, %v411_v8 }
  0x73   :  { %v389_v39 = vrot.slane %v388_v51, 1  ;;  %v406_v12 = vadd.f32 %v405_v9, %v404_v7  ;;  %v372_v43 = vadd.f32 %v371_v54, %v370_v36  ;;  %vm1523_vm14 = vcmask 1042434  }
  0x74   :  { %v381_v13 = vadd.f32 %v380_v10, %v379_v49  ;;  %v398_v14 = vrot.slane %v397_v59, 1  ;;  %v499_v18 = vsel %vm1522_vm9, %v363_v11, %v354_v28  ;;  %v414_v22 = vrot.slane %v413_v53, 2 }
  0x75   :  { %v390_v16 = vadd.f32 %v389_v39, %v388_v51  ;;  %v407_v44 = vrot.slane %v406_v12, 1  ;;  %v501_v24 = vsel %vm1523_vm14, %v372_v43, %v499_v18  ;;  %vm1524_vm7 = vcmask 1043459  }
  0x76   :  { %v399_v20 = vadd.f32 %v398_v14, %v397_v59  ;;  %v503_v29 = vsel %vm1524_vm7, %v381_v13, %v501_v24  ;;  %v415_v61 = vadd.f32 %v414_v22, %v413_v53  ;;  %vm1525_vm15 = vcmask 1044484  }
  0x77   :  { %v408_v60 = vadd.f32 %v407_v44, %v406_v12  ;;  %v505_v35 = vsel %vm1525_vm15, %v390_v16, %v503_v29 }
  0x78   :  { %v507_v58 = vsel %vm506_vm6, %v399_v20, %v505_v35  ;;  %v416_v41 = vrot.slane %v415_v61, 1 }
  0x79   :  { %v509_v55 = vsel %vm508_vm11, %v408_v60, %v507_v58 }
  0x7a   :  { %v417_v45 = vadd.f32 %v416_v41, %v415_v61 }
  0x7c   :  { %v511_v52 = vsel %vm510_vm2, %v417_v45, %v509_v55 }
  0x7d   :  { %529 = vrot.lane.b32.xlu1 %v511_v52, %s702_s25  ;;  %569 = vrot.lane.b32.xlu0 %v511_v52, %s705_s28 }
  0x81   :  { %537 = vrot.lane.b32.xlu1 %v511_v52, %s704_s27  ;;  %585 = vrot.lane.b32.xlu0 %v511_v52, %s708_s2 }
  0x85   :  { %545 = vrot.lane.b32.xlu1 %v511_v52, %s701_s0  ;;  %601 = vrot.lane.b32.xlu0 %v511_v52, %s710_s4 }
  0x89   :  { %553 = vrot.lane.b32.xlu1 %v511_v52, %s703_s26 }
  0x8d   :  { %561 = vrot.lane.b32.xlu1 %v511_v52, %s706_s29 }
  0x91   :  { %577 = vrot.lane.b32.xlu1 %v511_v52, %s707_s30 }
  0x95   :  { %593 = vrot.lane.b32.xlu1 %v511_v52, %s709_s3 }
  0x99   :  { %609 = vrot.lane.b32.xlu1 %v511_v52, %s711_s5 }
  0xb0   :  { %v532_v26 = vpop.permute.xlu0 %531  ;;  %v548_v2 = vpop.permute.xlu1 %547 }
  0xb1   :  { %v534_v56 = vmul.f32 0.9438743, %v532_v26  ;;  %v550_v57 = vmul.f32 0.8408964, %v548_v2 }
  0xb3   :  { %v536_v32 = vadd.f32 %v534_v56, %v1237_v37 }
  0xb4   :  { %v540_v47 = vpop.permute.xlu0 %539  ;;  %v556_v0 = vpop.permute.xlu1 %555 }
  0xb5   :  { %v542_v40 = vmul.f32 0.8908987, %v540_v47  ;;  %v558_v4 = vmul.f32 0.7937005, %v556_v0 }
  0xb7   :  { %v544_v62 = vadd.f32 %v542_v40, %v536_v32 }
  0xb8   :  { %v564_v1 = vpop.permute.xlu0 %563  ;;  %v572_v63 = vpop.permute.xlu1 %571 }
  0xb9   :  { %v552_v48 = vadd.f32 %v550_v57, %v544_v62  ;;  %v566_v33 = vmul.f32 0.74915355, %v564_v1  ;;  %v574_v31 = vmul.f32 0.70710677, %v572_v63 }
  0xbb   :  { %v560_v5 = vadd.f32 %v558_v4, %v552_v48 }
  0xbc   :  { %v580_v38 = vpop.permute.xlu0 %579 }
  0xbd   :  { %v568_v6 = vadd.f32 %v566_v33, %v560_v5  ;;  %v582_v19 = vmul.f32 0.6674199, %v580_v38 }
  0xbf   :  { %v576_v15 = vadd.f32 %v574_v31, %v568_v6 }
  0xc0   :  { %v588_v3 = vpop.permute.xlu0 %587 }
  0xc1   :  { %v584_v23 = vadd.f32 %v582_v19, %v576_v15  ;;  %v590_v37 = vmul.f32 0.62996054, %v588_v3 }
  0xc3   :  { %v592_v49 = vadd.f32 %v590_v37, %v584_v23 }
  0xc4   :  { %v596_v34 = vpop.permute.xlu0 %595 }
  0xc5   :  { %v598_v30 = vmul.f32 0.59460354, %v596_v34 }
  0xc7   :  { %v600_v8 = vadd.f32 %v598_v30, %v592_v49 }
  0xc8   :  { %v604_v17 = vpop.permute.xlu0 %603 }
  0xc9   :  { %v606_v42 = vmul.f32 0.561231, %v604_v17 }
  0xcb   :  { %v608_v54 = vadd.f32 %v606_v42, %v600_v8 }
  0xcc   :  { %v612_v7 = vpop.permute.xlu0 %611 }
  0xcd   :  { %v614_v50 = vmul.f32 0.5297316, %v612_v7 }
  0xcf   :  { %v616_v28 = vadd.f32 %v614_v50, %v608_v54 }
  0xd1   :  { %v617_v43 = vmax.f32 %v616_v28, 1e-06  ;;  %vm619_vm6 = vcmp.gt.f32.partialorder %v616_v28, 0.0 }
  0xd3   :  { %674 = vrcp.f32 %v617_v43 }
  0xdd   :  { %v675_v1 = vpop.eup %674 }
  0xef   :  { %v530_v21 = vpop.permute.xlu1 %529  ;;  %v570_v10 = vpop.permute.xlu0 %569 }
  0xf0   :  { %v533_v36 = vmul.f32 0.9438743, %v530_v21  ;;  %v573_v44 = vmul.f32 0.70710677, %v570_v10 }
  0xf2   :  { %v535_v51 = vadd.f32 %v533_v36, %v511_v52 }
  0xf3   :  { %v538_v25 = vpop.permute.xlu1 %537  ;;  %v586_v14 = vpop.permute.xlu0 %585 }
  0xf4   :  { %v541_v9 = vmul.f32 0.8908987, %v538_v25  ;;  %v589_v60 = vmul.f32 0.62996054, %v586_v14 }
  0xf6   :  { %v543_v11 = vadd.f32 %v541_v9, %v535_v51 }
  0xf7   :  { %v546_v46 = vpop.permute.xlu1 %545  ;;  %v602_v29 = vpop.permute.xlu0 %601 }
  0xf8   :  { %v549_v59 = vmul.f32 0.8408964, %v546_v46  ;;  %v605_v55 = vmul.f32 0.561231, %v602_v29 }
  0xfa   :  { %v551_v12 = vadd.f32 %v549_v59, %v543_v11 }
  0xfb   :  { %v554_v27 = vpop.permute.xlu1 %553 }
  0xfc   :  { %v557_v39 = vmul.f32 0.7937005, %v554_v27 }
  0xfe   :  { %v559_v53 = vadd.f32 %v557_v39, %v551_v12 }
  0xff   :  { %v562_v13 = vpop.permute.xlu1 %561 }
 0x100   :  { %v565_v16 = vmul.f32 0.74915355, %v562_v13 }
 0x102   :  { %v567_v18 = vadd.f32 %v565_v16, %v559_v53 }
 0x103   :  { %v578_v20 = vpop.permute.xlu1 %577 }
 0x104   :  { %v575_v22 = vadd.f32 %v573_v44, %v567_v18  ;;  %v581_v24 = vmul.f32 0.6674199, %v578_v20 }
 0x106   :  { %v583_v61 = vadd.f32 %v581_v24, %v575_v22 }
 0x107   :  { %v594_v35 = vpop.permute.xlu1 %593 }
 0x108   :  { %v591_v58 = vadd.f32 %v589_v60, %v583_v61  ;;  %v597_v41 = vmul.f32 0.59460354, %v594_v35 }
 0x10a   :  { %v599_v45 = vadd.f32 %v597_v41, %v591_v58 }
 0x10b   :  { %v610_v52 = vpop.permute.xlu1 %609 }
 0x10c   :  { %v607_v26 = vadd.f32 %v605_v55, %v599_v45  ;;  %v613_v47 = vmul.f32 0.5297316, %v610_v52 }
 0x10e   :  { %v615_v56 = vadd.f32 %v613_v47, %v607_v26 }
 0x110   :  { %v620_v40 = vmul.f32 %v675_v1, %v615_v56 }
 0x112   :  { %v621_v32 = vsel %vm619_vm6, %v620_v40, 0.5 }
 0x113   :  { %622 = vst [vmem:[#allocation2] sm:$0xff] %v621_v32 }
 0x114   :  { %687 = shalt.err (!%p684_p4)
}
 0x115   :  { %s688_s11 = scalar_lea.hbm %s1363_s1, 128 }
 0x116   :  { %p689_p5 = scmp.ne.s32.totalorder %s1363_s1, %s688_s11  ;;  %p692_p6 = scmp.lt.u32.totalorder %s688_s11, %s1363_s1 }
 0x118   :  { %p694_p7 = pnand %p692_p6, %p689_p5 }
 0x11a   :  { %697 = shalt.err (!%p694_p7)
}
 0x11b   :  { %632 = dma.vmem_to_hbm [thread:$0]  %s630_s7, 128, %s1363_s1, [#allocation3]  }
 0x11c   :  { %698 = dma.done.wait [#allocation3], 128  }
 0x11d   :  { %699 = vsyncadd [#allocation3], 4294967168 }
 0x11e   :  { %636 = vsyncpa [#allocation3], 1 }

</bundles_post_ra>
